<compile_context>
chip_gen: v5e
topology: v5e:2x2
jax: 0.10.0
libtpu: 0.0.40
codegen_flags: <defaults>
</compile_context>

<pallas_src>
import jax
import jax.numpy as jnp
from jax.experimental import pallas as pl
from jax.experimental.pallas import tpu as pltpu

HIDDEN = 400    # logical hidden size (nn.Linear(input_dim+num_classes, 400))
LANE = 128
SUBLANE = 8


def _round_up(n, m):
    return ((n + m - 1) // m) * m


def encoder_kernel(x_ref, y_ref, w1x_ref, w1y_ref, b1_ref, wh_ref, bh_ref, out_ref):
    # fc1 as a split-K bf16 matmul with f32 accumulation (avoids materializing
    # concat([x, y_soft]) in HBM).
    h = jnp.dot(x_ref[...], w1x_ref[...], preferred_element_type=jnp.float32)
    h = h + jnp.dot(y_ref[...], w1y_ref[...], preferred_element_type=jnp.float32)
    h = jnp.maximum(h + b1_ref[...], 0.0)                 # f32 bias + ReLU (VPU)
    # fused mu/logvar head -> one lane-dense (padded) f32 output slab
    out_ref[...] = (jnp.dot(h.astype(wh_ref.dtype), wh_ref[...],
                            preferred_element_type=jnp.float32)
                    + bh_ref[...])


def encoder_forward(x, y_soft, params, *, batch_tile=512):
    """x: (B, C, H, W) float32 (NCHW like PyTorch). y_soft: (B, num_classes)."""
    B = x.shape[0]
    # flatten like torch .view(B, -1); cast activations to bf16 for the MXU /
    # to halve activation DMA bytes (accumulation stays f32 in-kernel).
    x_flat = x.reshape(B, -1).astype(jnp.bfloat16)
    y = y_soft.astype(jnp.bfloat16)

    w1x, w1y, b1 = params["w1x"], params["w1y"], params["b1"]
    w_head, b_head = params["w_head"], params["b_head"]
    latent_dim = params["latent_dim"]

    d_x = x_flat.shape[1]
    n_cls = y.shape[1]
    hidden_pad = w1x.shape[1]
    out_pad = w_head.shape[1]

    # Batch tiling policy: pick a tile <= batch_tile and pad the batch up to a
    # multiple of it, so the grid never collapses to one oversized block
    # (keeps double-buffered activation DMA + megacore sharding, bounds VMEM).
    tile_b = min(batch_tile, _round_up(B, SUBLANE))
    B_pad = _round_up(B, tile_b)
    if B_pad != B:
        pad = B_pad - B
        x_flat = jnp.pad(x_flat, ((0, pad), (0, 0)))
        y = jnp.pad(y, ((0, pad), (0, 0)))
    grid = (B_pad // tile_b,)

    # Explicit VMEM budget (double-buffered tiles + resident weights + h), with
    # 2x headroom, capped under v7x's 64 MiB physical VMEM.
    bpe = 2  # bf16
    vmem_bytes = (
        2 * tile_b * d_x * bpe            # x tile (double buffered)
        + 2 * tile_b * n_cls * bpe        # y tile
        + 2 * d_x * hidden_pad * bpe      # W1[:d_x]
        + 2 * n_cls * hidden_pad * bpe    # W1[d_x:]
        + 2 * hidden_pad * 4              # b1 (f32)
        + 2 * hidden_pad * out_pad * bpe  # fused head W
        + 2 * out_pad * 4                 # fused head b (f32)
        + 2 * tile_b * out_pad * 4        # output slab (f32, double buffered)
        + tile_b * hidden_pad * 4         # h intermediate (f32)
    )
    vmem_limit = int(min(max(2 * vmem_bytes, 16 * 1024 * 1024), 60 * 1024 * 1024))

    cost = pl.CostEstimate(
        flops=2 * B_pad * ((d_x + n_cls) * HIDDEN + HIDDEN * 2 * latent_dim),
        transcendentals=0,
        bytes_accessed=(bpe * (x_flat.size + y.size + w1x.size + w1y.size
                               + w_head.size)
                        + 4 * (b1.size + b_head.size + B_pad * out_pad)),
    )

    out = pl.pallas_call(
        encoder_kernel,
        out_shape=jax.ShapeDtypeStruct((B_pad, out_pad), jnp.float32),
        grid_spec=pltpu.PrefetchScalarGridSpec(
            num_scalar_prefetch=0,
            grid=grid,
            in_specs=[
                pl.BlockSpec((tile_b, d_x), lambda i: (i, 0)),          # x tile
                pl.BlockSpec((tile_b, n_cls), lambda i: (i, 0)),        # y_soft tile
                pl.BlockSpec((d_x, hidden_pad), lambda i: (0, 0)),      # W1[:d_x]
                pl.BlockSpec((n_cls, hidden_pad), lambda i: (0, 0)),    # W1[d_x:]
                pl.BlockSpec((1, hidden_pad), lambda i: (0, 0)),        # b1
                pl.BlockSpec((hidden_pad, out_pad), lambda i: (0, 0)),  # fused head W
                pl.BlockSpec((1, out_pad), lambda i: (0, 0)),           # fused head b
            ],
            out_specs=pl.BlockSpec((tile_b, out_pad), lambda i: (i, 0)),
        ),
        compiler_params=pltpu.CompilerParams(
            dimension_semantics=("parallel",),
            vmem_limit_bytes=vmem_limit,
        ),
        cost_estimate=cost,
    )(x_flat, y, w1x, w1y, b1, w_head, b_head)

    mu = out[:B, :latent_dim]
    logvar = out[:B, latent_dim:2 * latent_dim]
    return mu, logvar


def init_params(key, input_dim, latent_dim, num_classes):
    """Deterministic synthetic parameters matching nn.Linear shapes, stored in
    the padded / fused / bf16 kernel layout (W has shape (in, out))."""
    hidden = HIDDEN
    hidden_pad = _round_up(hidden, LANE)                   # 400 -> 512
    out_pad = max(LANE, _round_up(2 * latent_dim, LANE))   # lane-dense output width

    d_in = input_dim + num_classes
    k1, k2, k3, k4, k5, k6 = jax.random.split(key, 6)

    def lin(kw, kb, fan_in, fan_out):
        bound = 1.0 / jnp.sqrt(fan_in)
        w = jax.random.uniform(kw, (fan_in, fan_out), jnp.float32, -bound, bound)
        b = jax.random.uniform(kb, (1, fan_out), jnp.float32, -bound, bound)
        return w, b

    w1, b1 = lin(k1, k2, d_in, hidden)                     # (d_in, 400), (1, 400)
    w_mu, b_mu = lin(k3, k4, hidden, latent_dim)
    w_lv, b_lv = lin(k5, k6, hidden, latent_dim)

    # fc1 split by input source (x | y_soft); cols zero-padded 400 -> 512; bf16.
    w1x = jnp.zeros((input_dim, hidden_pad), jnp.float32).at[:, :hidden].set(w1[:input_dim])
    w1y = jnp.zeros((num_classes, hidden_pad), jnp.float32).at[:, :hidden].set(w1[input_dim:])
    b1p = jnp.zeros((1, hidden_pad), jnp.float32).at[:, :hidden].set(b1)

    # fused mu/logvar head: rows zero-padded 400 -> 512, cols padded to out_pad; bf16.
    w_head = jnp.zeros((hidden_pad, out_pad), jnp.float32)
    w_head = w_head.at[:hidden, :latent_dim].set(w_mu)
    w_head = w_head.at[:hidden, latent_dim:2 * latent_dim].set(w_lv)
    b_head = jnp.zeros((1, out_pad), jnp.float32)
    b_head = b_head.at[:, :latent_dim].set(b_mu)
    b_head = b_head.at[:, latent_dim:2 * latent_dim].set(b_lv)

    return {
        "w1x": w1x.astype(jnp.bfloat16),
        "w1y": w1y.astype(jnp.bfloat16),
        "b1": b1p,                                   # f32 (epilogue)
        "w_head": w_head.astype(jnp.bfloat16),
        "b_head": b_head,                            # f32 (epilogue)
        "latent_dim": latent_dim,
        # unpadded f32 originals kept only for the pure-JAX reference check
        "ref": {"w1": w1, "b1": b1, "w_mu": w_mu, "b_mu": b_mu,
                "w_lv": w_lv, "b_lv": b_lv},
    }


if __name__ == "__main__":
    key = jax.random.PRNGKey(0)
    kx, ky, kp = jax.random.split(key, 3)

    # Small shapes: batch=8, 1x8x8 images -> input_dim=64, 10 classes, latent=16.
    B, C, H, W = 8, 1, 8, 8
    input_dim = C * H * W
    num_classes = 10
    latent_dim = 16

    x = jax.random.normal(kx, (B, C, H, W), jnp.float32)         # NCHW like torch
    logits = jax.random.normal(ky, (B, num_classes), jnp.float32)
    y_soft = jax.nn.softmax(logits, axis=-1)

    params = init_params(kp, input_dim, latent_dim, num_classes)

    mu, logvar = encoder_forward(x, y_soft, params)
    jax.block_until_ready((mu, logvar))

    # Reference check in plain JAX/f32 (same math as the PyTorch forward).
    # Tolerance loosened because the kernel runs bf16 matmuls with f32 accum.
    r = params["ref"]
    xin = jnp.concatenate([x.reshape(B, -1), y_soft], axis=1)
    h_ref = jnp.maximum(xin @ r["w1"] + r["b1"], 0.0)
    mu_ref = h_ref @ r["w_mu"] + r["b_mu"]
    lv_ref = h_ref @ r["w_lv"] + r["b_lv"]
    assert mu.shape == (B, latent_dim) and logvar.shape == (B, latent_dim)
    assert jnp.allclose(mu, mu_ref, atol=5e-2, rtol=5e-2), "mu mismatch"
    assert jnp.allclose(logvar, lv_ref, atol=5e-2, rtol=5e-2), "logvar mismatch"

    print("KERNEL_OK")
</pallas_src>

<mosaic_0001>
module attributes {stable_mosaic.version = 11 : i64} {
  func.func @encoder_kernel(%arg0: i32, %arg1: memref<8x64xbf16, #tpu.memory_space<vmem>>, %arg2: memref<8x10xbf16, #tpu.memory_space<vmem>>, %arg3: memref<64x512xbf16, #tpu.memory_space<vmem>>, %arg4: memref<10x512xbf16, #tpu.memory_space<vmem>>, %arg5: memref<1x512xf32, #tpu.memory_space<vmem>>, %arg6: memref<512x128xbf16, #tpu.memory_space<vmem>>, %arg7: memref<1x128xf32, #tpu.memory_space<vmem>>, %arg8: memref<8x128xf32, #tpu.memory_space<vmem>>) attributes {dimension_semantics = [#tpu.dimension_semantics<parallel>], iteration_bounds = array<i64: 1>, scalar_prefetch = 0 : i64, scratch_operands = 0 : i64, tpu.core_type = #tpu.core_type<tc>, window_params = [{transform_indices = @transform_0, window_bounds = array<i64: 8, 64>}, {transform_indices = @transform_1, window_bounds = array<i64: 8, 10>}, {pipeline_mode = #tpu.pipeline_mode<synchronous>, transform_indices = @transform_2, window_bounds = array<i64: 64, 512>}, {pipeline_mode = #tpu.pipeline_mode<synchronous>, transform_indices = @transform_3, window_bounds = array<i64: 10, 512>}, {pipeline_mode = #tpu.pipeline_mode<synchronous>, transform_indices = @transform_4, window_bounds = array<i64: 1, 512>}, {pipeline_mode = #tpu.pipeline_mode<synchronous>, transform_indices = @transform_5, window_bounds = array<i64: 512, 128>}, {pipeline_mode = #tpu.pipeline_mode<synchronous>, transform_indices = @transform_6, window_bounds = array<i64: 1, 128>}, {transform_indices = @transform_7, window_bounds = array<i64: 8, 128>}]} {
    %c0 = arith.constant 0 : index
    %c0_0 = arith.constant 0 : index
    %0 = vector.load %arg1[%c0, %c0_0] : memref<8x64xbf16, #tpu.memory_space<vmem>>, vector<8x64xbf16>
    %c0_1 = arith.constant 0 : index
    %c0_2 = arith.constant 0 : index
    %1 = vector.load %arg3[%c0_1, %c0_2] : memref<64x512xbf16, #tpu.memory_space<vmem>>, vector<64x512xbf16>
    %cst = arith.constant dense<0.000000e+00> : vector<8x512xf32>
    %2 = tpu.matmul %0, %1, %cst {dimension_numbers = #tpu.dot_dimension_numbers<[1], [0], [0], [1], [0, 0, 1, 1], [], []>} : vector<8x64xbf16>, vector<64x512xbf16>, vector<8x512xf32> -> vector<8x512xf32>
    %c0_3 = arith.constant 0 : index
    %c0_4 = arith.constant 0 : index
    %3 = vector.load %arg2[%c0_3, %c0_4] : memref<8x10xbf16, #tpu.memory_space<vmem>>, vector<8x10xbf16>
    %c0_5 = arith.constant 0 : index
    %c0_6 = arith.constant 0 : index
    %4 = vector.load %arg4[%c0_5, %c0_6] : memref<10x512xbf16, #tpu.memory_space<vmem>>, vector<10x512xbf16>
    %cst_7 = arith.constant dense<0.000000e+00> : vector<8x512xf32>
    %5 = tpu.matmul %3, %4, %cst_7 {dimension_numbers = #tpu.dot_dimension_numbers<[1], [0], [0], [1], [0, 0, 1, 1], [], []>} : vector<8x10xbf16>, vector<10x512xbf16>, vector<8x512xf32> -> vector<8x512xf32>
    %6 = arith.addf %2, %5 : vector<8x512xf32>
    %c0_8 = arith.constant 0 : index
    %c0_9 = arith.constant 0 : index
    %7 = vector.load %arg5[%c0_8, %c0_9] : memref<1x512xf32, #tpu.memory_space<vmem>>, vector<1x512xf32>
    %8 = vector.broadcast %7 : vector<1x512xf32> to vector<8x512xf32>
    %9 = arith.addf %6, %8 : vector<8x512xf32>
    %cst_10 = arith.constant 0.000000e+00 : f32
    %10 = vector.broadcast %cst_10 : f32 to vector<8x512xf32>
    %11 = arith.maximumf %9, %10 : vector<8x512xf32>
    %12 = arith.truncf %11 : vector<8x512xf32> to vector<8x512xbf16>
    %c0_11 = arith.constant 0 : index
    %c0_12 = arith.constant 0 : index
    %13 = vector.load %arg6[%c0_11, %c0_12] : memref<512x128xbf16, #tpu.memory_space<vmem>>, vector<512x128xbf16>
    %cst_13 = arith.constant dense<0.000000e+00> : vector<8x128xf32>
    %14 = tpu.matmul %12, %13, %cst_13 {dimension_numbers = #tpu.dot_dimension_numbers<[1], [0], [0], [1], [0, 0, 1, 1], [], []>} : vector<8x512xbf16>, vector<512x128xbf16>, vector<8x128xf32> -> vector<8x128xf32>
    %c0_14 = arith.constant 0 : index
    %c0_15 = arith.constant 0 : index
    %15 = vector.load %arg7[%c0_14, %c0_15] : memref<1x128xf32, #tpu.memory_space<vmem>>, vector<1x128xf32>
    %16 = vector.broadcast %15 : vector<1x128xf32> to vector<8x128xf32>
    %17 = arith.addf %14, %16 : vector<8x128xf32>
    %c0_16 = arith.constant 0 : index
    %c0_17 = arith.constant 0 : index
    %18 = vector.load %arg8[%c0_16, %c0_17] : memref<8x128xf32, #tpu.memory_space<vmem>>, vector<8x128xf32>
    tpu.vector_store %arg8[%c0_16, %c0_17], %17 {strides = array<i32>} : memref<8x128xf32, #tpu.memory_space<vmem>>, vector<8x128xf32>,
    return
  }
  func.func @transform_0(%arg0: i32) -> (i32, i32) {
    %c0_i32 = arith.constant 0 : i32
    %c0_i32_0 = arith.constant 0 : i32
    return %arg0, %c0_i32 : i32, i32
  }
  func.func @transform_1(%arg0: i32) -> (i32, i32) {
    %c0_i32 = arith.constant 0 : i32
    %c0_i32_0 = arith.constant 0 : i32
    return %arg0, %c0_i32 : i32, i32
  }
  func.func @transform_2(%arg0: i32) -> (i32, i32) {
    %c0_i32 = arith.constant 0 : i32
    %c0_i32_0 = arith.constant 0 : i32
    %c0_i32_1 = arith.constant 0 : i32
    return %c0_i32, %c0_i32_0 : i32, i32
  }
  func.func @transform_3(%arg0: i32) -> (i32, i32) {
    %c0_i32 = arith.constant 0 : i32
    %c0_i32_0 = arith.constant 0 : i32
    %c0_i32_1 = arith.constant 0 : i32
    return %c0_i32, %c0_i32_0 : i32, i32
  }
  func.func @transform_4(%arg0: i32) -> (i32, i32) {
    %c0_i32 = arith.constant 0 : i32
    %c0_i32_0 = arith.constant 0 : i32
    %c0_i32_1 = arith.constant 0 : i32
    return %c0_i32, %c0_i32_0 : i32, i32
  }
  func.func @transform_5(%arg0: i32) -> (i32, i32) {
    %c0_i32 = arith.constant 0 : i32
    %c0_i32_0 = arith.constant 0 : i32
    %c0_i32_1 = arith.constant 0 : i32
    return %c0_i32, %c0_i32_0 : i32, i32
  }
  func.func @transform_6(%arg0: i32) -> (i32, i32) {
    %c0_i32 = arith.constant 0 : i32
    %c0_i32_0 = arith.constant 0 : i32
    %c0_i32_1 = arith.constant 0 : i32
    return %c0_i32, %c0_i32_0 : i32, i32
  }
  func.func @transform_7(%arg0: i32) -> (i32, i32) {
    %c0_i32 = arith.constant 0 : i32
    %c0_i32_0 = arith.constant 0 : i32
    return %arg0, %c0_i32 : i32, i32
  }
}

</mosaic_0001>

<bundles_post_ra>
// kernel: tpu_custom_call.1
= control target key start
LH: loop header
LB: loop body
LE: loop exit
PB: predicated region body
PF: predicated region fallthrough
CT: control target
= control target key end

     0   :  { %12 = vsyncpa [#allocation3], 0  ;;  %s1255_s0 = inlined_call_operand.hbm [shape: bf16[8,64], index: 0, kind: input, shape index: {}]   ;;  %s1256_s1 = inlined_call_operand.hbm [shape: bf16[8,10], index: 1, kind: input, shape index: {}]   ;;  %s1257_s2 = inlined_call_operand.hbm [shape: bf16[64,512], index: 2, kind: input, shape index: {}]   ;;  %s1258_s3 = inlined_call_operand.hbm [shape: bf16[10,512], index: 3, kind: input, shape index: {}]   ;;  %s1259_s4 = inlined_call_operand.hbm [shape: f32[1,512], index: 4, kind: input, shape index: {}]   ;;  %s1260_s5 = inlined_call_operand.hbm [shape: bf16[512,128], index: 5, kind: input, shape index: {}]   ;;  %s1261_s6 = inlined_call_operand.vmem [shape: f32[1,128], index: 6, kind: input, shape index: {}]   ;;  %s1262_s7 = inlined_call_operand.hbm [shape: f32[8,128], index: 7, kind: output, shape index: {}]  }
   0x1   :  { %13 = vsyncpa [#allocation6], 0 }
   0x2   :  { %14 = vsyncpa [#allocation9], 0 }
   0x3   :  { %15 = vsyncpa [#allocation12], 0  ;;  %s33_s26 = sshll.u32 %s1256_s1, 4  ;;  %s34_s26 = int_to_ptr.hbm [resolvable:$true] %s33_s26 }
   0x4   :  { %16 = vsyncpa [#allocation4], 0  ;;  %s1172_s27 = smov [#allocation5]   ;;  %s56_s8 = sshll.u32 %s1258_s3, 4  ;;  %s57_s8 = int_to_ptr.hbm [resolvable:$true] %s56_s8 }
   0x5   :  { %s35_s28 = sshll.u32 %s1172_s27, 4  ;;  %s1173_s9 = smov [#allocation8]   ;;  %s36_s28 = int_to_ptr.vmem [resolvable:$true] %s35_s28 }
   0x6   :  { %38 = dma.hbm_to_vmem [thread:$0]  %s34_s26, 64, %s36_s28, [#allocation6]  }
   0x7   :  { %s58_s10 = sshll.u32 %s1173_s9, 4  ;;  %s22_s13 = sshll.u32 %s1255_s0, 4  ;;  %s59_s10 = int_to_ptr.vmem [resolvable:$true] %s58_s10  ;;  %s23_s13 = int_to_ptr.hbm [resolvable:$true] %s22_s13 }
   0x8   :  { %s1174_s1 = smov 256   ;;  %s1175_s14 = smov 16  }
   0x9   :  { %64 = dma.hbm_to_vmem [thread:$0]  %s57_s8, 512, %s59_s10, [#allocation9], %s1174_s1, %s1174_s1, %s1175_s14  }
   0xa   :  { %s43_s17 = sshll.u32 %s1257_s2, 4  ;;  %s1176_s18 = smov [#allocation2]   ;;  %s44_s17 = int_to_ptr.hbm [resolvable:$true] %s43_s17 }
   0xb   :  { %s24_s19 = sshll.u32 %s1176_s18, 4  ;;  %s1177_s3 = smov [#allocation7]   ;;  %s25_s19 = int_to_ptr.vmem [resolvable:$true] %s24_s19 }
   0xc   :  { %27 = dma.hbm_to_vmem [thread:$0]  %s23_s13, 64, %s25_s19, [#allocation3]  }
   0xd   :  { %s45_s20 = sshll.u32 %s1177_s3, 4  ;;  %s70_s0 = sshll.u32 %s1259_s4, 4  ;;  %s46_s20 = int_to_ptr.vmem [resolvable:$true] %s45_s20  ;;  %s71_s0 = int_to_ptr.hbm [resolvable:$true] %s70_s0 }
   0xe   :  { %51 = dma.hbm_to_vmem [thread:$0]  %s44_s17, 2048, %s46_s20, [#allocation6], %s1174_s1, %s1174_s1, %s1175_s14  }
   0xf   :  { %s80_s25 = sshll.u32 %s1260_s5, 4  ;;  %s1178_s26 = smov [#allocation10]   ;;  %s81_s25 = int_to_ptr.hbm [resolvable:$true] %s80_s25 }
  0x10   :  { %s72_s2 = sshll.u32 %s1178_s26, 4  ;;  %s1179_s27 = smov [#allocation11]   ;;  %s73_s2 = int_to_ptr.vmem [resolvable:$true] %s72_s2 }
  0x11   :  { %75 = dma.hbm_to_vmem [thread:$0]  %s71_s0, 64, %s73_s2, [#allocation9]  }
  0x12   :  { %s82_s28 = sshll.u32 %s1179_s27, 4  ;;  %s1180_s29 = smov 64   ;;  %s83_s28 = int_to_ptr.vmem [resolvable:$true] %s82_s28 }
  0x13   :  { %s1181_s30 = smov 4  }
  0x14   :  { %88 = dma.hbm_to_vmem [thread:$0]  %s81_s25, 4096, %s83_s28, [#allocation12], %s1180_s29, %s1180_s29, %s1181_s30  }
  0x15   :  { %1162 = dma.done.wait [#allocation3], 64  }
  0x16   :  { %1163 = vsyncadd [#allocation3], 4294967232 }
  0x17   :  { %1164 = dma.done.wait [#allocation6], 2112  }
  0x18   :  { %1165 = vsyncadd [#allocation6], 4294965184 }
  0x19   :  { %1166 = dma.done.wait [#allocation9], 576  }
  0x1a   :  { %1167 = vsyncadd [#allocation9], 4294966720 }
  0x1b   :  { %1168 = dma.done.wait [#allocation12], 4096  }
  0x1c   :  { %1169 = vsyncadd [#allocation12], 4294963200  ;;  %vm158_vm0 = vcmask 1044480   ;;  %v716_v0 = vld [vmem:[#allocation8] sm:$0xf]  ;;  %vm154_vm1 = vcmask 80896  }
  0x1d   :  { %v948_v1 = vld [vmem:[#allocation8 + $0xc] sm:$0x10]  ;;  %v946_v2 = vld [vmem:[#allocation8 + $0x4] sm:$0xf]  ;;  %v718_v4 = vld [vmem:[#allocation8 + $0x10] sm:$0x10] }
  0x1e   :  { %v717_v3 = vor.u32 %v948_v1, %v716_v0  ;;  %v724_v5 = vld [vmem:[#allocation8 + $0x8] sm:$0xf]  ;;  %v949_v6 = vld [vmem:[#allocation8 + $0x14] sm:$0x10]  ;;  %v721_v7 = vor.u32 %v946_v2, %v718_v4  ;;  %v947_v9 = vld [vmem:[#allocation8 + $0xc] sm:$0xf] }
  0x1f   :  { %v725_v8 = vor.u32 %v949_v6, %v724_v5  ;;  %v726_v10 = vld [vmem:[#allocation8 + $0x18] sm:$0x10]  ;;  %v792_v14 = vld [vmem:[#allocation7 + $0x68] sm:$0xf]  ;;  %v945_v15 = vld [vmem:[#allocation7 + $0x74] sm:$0xf0] }
  0x20   :  { %v133_v11 = vld [vmem:[#allocation5] sm:$0xf]  ;;  %v160_v12 = vsel %vm158_vm0, %v717_v3, 0  ;;  %v729_v13 = vor.u32 %v947_v9, %v726_v10  ;;  %v163_v16 = vsel %vm158_vm0, %v721_v7, 0  ;;  %v793_v18 = vor.u32 %v945_v15, %v792_v14  ;;  %v943_v19 = vld [vmem:[#allocation7 + $0x6c] sm:$0xf] }
  0x21   :  { %178 = vmatpush.bf16.msra.mxu0 %v160_v12  ;;  %v166_v17 = vsel %vm158_vm0, %v725_v8, 0  ;;  %v794_v20 = vld [vmem:[#allocation7 + $0x78] sm:$0xf0]  ;;  %191 = vmatpush.bf16.msra.mxu1 %v163_v16  ;;  %v784_v23 = vld [vmem:[#allocation7 + $0x60] sm:$0xf]  ;;  %vm303_vm2 = vcmask 523264  }
  0x22   :  { %204 = vmatpush.bf16.msra.mxu2 %v166_v17  ;;  %v169_v21 = vsel %vm158_vm0, %v729_v13, 0  ;;  %v797_v22 = vor.u32 %v943_v19, %v794_v20  ;;  %v944_v24 = vld [vmem:[#allocation7 + $0x6c] sm:$0xf0]  ;;  %v942_v26 = vld [vmem:[#allocation7 + $0x64] sm:$0xf]  ;;  %v957_v1 = vld [vmem:[#allocation11 + $0x38] sm:$0xff] }
  0x23   :  { %217 = vmatpush.bf16.msra.mxu3 %v169_v21  ;;  %v785_v25 = vor.u32 %v944_v24, %v784_v23  ;;  %v786_v27 = vld [vmem:[#allocation7 + $0x70] sm:$0xf0]  ;;  %v776_v28 = vld [vmem:[#allocation7 + $0x48] sm:$0xf]  ;;  %v941_v30 = vld [vmem:[#allocation7 + $0x54] sm:$0xf0] }
  0x24   :  { %730 = vmatmul.msk.bf16.vlgmr.msra.gmra.mxu0 %vm154_vm1, %v133_v11  ;;  %v789_v29 = vor.u32 %v942_v26, %v786_v27  ;;  %v939_v31 = vld [vmem:[#allocation7 + $0x4c] sm:$0xf]  ;;  %v778_v32 = vld [vmem:[#allocation7 + $0x58] sm:$0xf0]  ;;  %731 = vmatmul.msk.bf16.vlgmr.msra.gmra.mxu1 %vm154_vm1, %v133_v11  ;;  %v777_v33 = vor.u32 %v941_v30, %v776_v28  ;;  %v768_v35 = vld [vmem:[#allocation7 + $0x40] sm:$0xf] }
  0x25   :  { %732 = vmatmul.msk.bf16.vlgmr.msra.gmra.mxu2 %vm154_vm1, %v133_v11  ;;  %v781_v34 = vor.u32 %v939_v31, %v778_v32  ;;  %v940_v36 = vld [vmem:[#allocation7 + $0x4c] sm:$0xf0]  ;;  %v938_v37 = vld [vmem:[#allocation7 + $0x44] sm:$0xf]  ;;  %311 = vmatpush.bf16.msrb.mxu0 %v785_v25  ;;  %v770_v39 = vld [vmem:[#allocation7 + $0x50] sm:$0xf0] }
  0x26   :  { %337 = vmatpush.bf16.msrb.mxu2 %v793_v18  ;;  %733 = vmatmul.msk.bf16.vlgmr.msra.gmra.mxu3 %vm154_vm1, %v133_v11  ;;  %v769_v38 = vor.u32 %v940_v36, %v768_v35  ;;  %v760_v40 = vld [vmem:[#allocation7 + $0x28] sm:$0xf]  ;;  %v937_v41 = vld [vmem:[#allocation7 + $0x34] sm:$0xf0]  ;;  %v773_v42 = vor.u32 %v938_v37, %v770_v39  ;;  %v935_v44 = vld [vmem:[#allocation7 + $0x2c] sm:$0xf] }
  0x27   :  { %350 = vmatpush.bf16.msrb.mxu3 %v797_v22  ;;  %324 = vmatpush.bf16.msrb.mxu1 %v789_v29  ;;  %v761_v43 = vor.u32 %v937_v41, %v760_v40  ;;  %v762_v45 = vld [vmem:[#allocation7 + $0x38] sm:$0xf0]  ;;  %v752_v46 = vld [vmem:[#allocation7 + $0x20] sm:$0xf]  ;;  %v936_v48 = vld [vmem:[#allocation7 + $0x2c] sm:$0xf0] }
  0x28   :  { %v765_v47 = vor.u32 %v935_v44, %v762_v45  ;;  %v934_v49 = vld [vmem:[#allocation7 + $0x24] sm:$0xf]  ;;  %v754_v50 = vld [vmem:[#allocation7 + $0x30] sm:$0xf0]  ;;  %v744_v51 = vld [vmem:[#allocation7 + $0x8] sm:$0xf]  ;;  %v753_v54 = vor.u32 %v936_v48, %v752_v46 }
  0x29   :  { %v933_v52 = vld [vmem:[#allocation7 + $0x14] sm:$0xf0]  ;;  %v931_v53 = vld [vmem:[#allocation7 + $0xc] sm:$0xf]  ;;  %312 = vmatpush.bf16.msrb.mxu0 %v769_v38  ;;  %v746_v55 = vld [vmem:[#allocation7 + $0x18] sm:$0xf0]  ;;  %v757_v56 = vor.u32 %v934_v49, %v754_v50 }
  0x2a   :  { %338 = vmatpush.bf16.msrb.mxu2 %v777_v33  ;;  %v745_v57 = vor.u32 %v933_v52, %v744_v51  ;;  %v736_v58 = vld [vmem:[#allocation7] sm:$0xf]  ;;  %v932_v59 = vld [vmem:[#allocation7 + $0xc] sm:$0xf0]  ;;  %v749_v60 = vor.u32 %v931_v53, %v746_v55  ;;  %v930_v61 = vld [vmem:[#allocation7 + $0x4] sm:$0xf] }
  0x2b   :  { %351 = vmatpush.bf16.msrb.mxu3 %v781_v34  ;;  %325 = vmatpush.bf16.msrb.mxu1 %v773_v42  ;;  %v738_v62 = vld [vmem:[#allocation7 + $0x10] sm:$0xf0]  ;;  %v737_v63 = vor.u32 %v932_v59, %v736_v58  ;;  %v965_v2 = vld [vmem:[#allocation11 + $0x78] sm:$0xff]  ;;  %v116_v3 = vld [vmem:[#allocation2] sm:$0xf]  ;;  %s1182_s8 = smov [#allocation13]  }
  0x2c   :  { %v741_v0 = vor.u32 %v930_v61, %v738_v62  ;;  %v956_v4 = vld [vmem:[#allocation11 + $0x30] sm:$0xff]  ;;  %v973_v6 = vld [vmem:[#allocation11 + $0xb8] sm:$0xff]  ;;  %v955_v8 = vld [vmem:[#allocation11 + $0x28] sm:$0xff]  ;;  %s699_s9 = sshll.u32 %s1182_s8, 4  ;;  %s701_s12 = sshll.u32 %s1262_s7, 4  ;;  %s700_s9 = int_to_ptr.vmem [resolvable:$true] %s699_s9  ;;  %s702_s12 = int_to_ptr.hbm [resolvable:$true] %s701_s12 }
  0x2d   :  { %313 = vmatpush.bf16.msrb.mxu0 %v753_v54  ;;  %v964_v5 = vld [vmem:[#allocation11 + $0x70] sm:$0xff]  ;;  %v981_v7 = vld [vmem:[#allocation11 + $0xf8] sm:$0xff]  ;;  %v963_v9 = vld [vmem:[#allocation11 + $0x68] sm:$0xff] }
  0x2e   :  { %339 = vmatpush.bf16.msrb.mxu2 %v761_v43  ;;  %v972_v10 = vld [vmem:[#allocation11 + $0xb0] sm:$0xff]  ;;  %v954_v12 = vld [vmem:[#allocation11 + $0x20] sm:$0xff]  ;;  %v971_v14 = vld [vmem:[#allocation11 + $0xa8] sm:$0xff] }
  0x2f   :  { %352 = vmatpush.bf16.msrb.mxu3 %v765_v47  ;;  %326 = vmatpush.bf16.msrb.mxu1 %v757_v56  ;;  %v980_v11 = vld [vmem:[#allocation11 + $0xf0] sm:$0xff]  ;;  %v962_v13 = vld [vmem:[#allocation11 + $0x60] sm:$0xff]  ;;  %v979_v15 = vld [vmem:[#allocation11 + $0xe8] sm:$0xff] }
  0x30   :  { %v953_v16 = vld [vmem:[#allocation11 + $0x18] sm:$0xff]  ;;  %v970_v18 = vld [vmem:[#allocation11 + $0xa0] sm:$0xff]  ;;  %v952_v20 = vld [vmem:[#allocation11 + $0x10] sm:$0xff] }
  0x31   :  { %314 = vmatpush.bf16.msrb.mxu0 %v737_v63  ;;  %v961_v17 = vld [vmem:[#allocation11 + $0x58] sm:$0xff]  ;;  %v978_v19 = vld [vmem:[#allocation11 + $0xe0] sm:$0xff]  ;;  %v960_v21 = vld [vmem:[#allocation11 + $0x50] sm:$0xff] }
  0x32   :  { %340 = vmatpush.bf16.msrb.mxu2 %v745_v57  ;;  %v969_v22 = vld [vmem:[#allocation11 + $0x98] sm:$0xff]  ;;  %v951_v24 = vld [vmem:[#allocation11 + $0x8] sm:$0xff]  ;;  %v968_v26 = vld [vmem:[#allocation11 + $0x90] sm:$0xff] }
  0x33   :  { %353 = vmatpush.bf16.msrb.mxu3 %v749_v60  ;;  %327 = vmatpush.bf16.msrb.mxu1 %v741_v0  ;;  %v977_v23 = vld [vmem:[#allocation11 + $0xd8] sm:$0xff]  ;;  %v959_v25 = vld [vmem:[#allocation11 + $0x48] sm:$0xff]  ;;  %v976_v27 = vld [vmem:[#allocation11 + $0xd0] sm:$0xff] }
  0x34   :  { %798 = vmatmul.msk.bf16.vlgmr.msrb.gmra.mxu0 %vm303_vm2, %v116_v3  ;;  %v950_v28 = vld [vmem:[#allocation11] sm:$0xff]  ;;  %v967_v30 = vld [vmem:[#allocation11 + $0x88] sm:$0xff]  ;;  %v359_v40 = vld [vmem:[#allocation10] sm:$0xf] }
  0x35   :  { %641 = vmatpush.bf16.msra.mxu0 %v957_v1  ;;  %800 = vmatmul.msk.bf16.vlgmr.msrb.gmra.mxu2 %vm303_vm2, %v116_v3  ;;  %v958_v29 = vld [vmem:[#allocation11 + $0x40] sm:$0xff]  ;;  %v975_v31 = vld [vmem:[#allocation11 + $0xc8] sm:$0xff]  ;;  %v361_v43 = vperm.slane %v359_v40, 0  ;;  %v362_v45 = vperm.slane %v359_v40, 1  ;;  %v363_v52 = vperm.slane %v359_v40, 2  ;;  %v364_v55 = vperm.slane %v359_v40, 3 }
  0x36   :  { %799 = vmatmul.msk.bf16.vlgmr.msrb.gmra.mxu1 %vm303_vm2, %v116_v3  ;;  %801 = vmatmul.msk.bf16.vlgmr.msrb.gmra.mxu3 %vm303_vm2, %v116_v3  ;;  %v966_v32 = vld [vmem:[#allocation11 + $0x80] sm:$0xff] }
  0x37   :  { %654 = vmatpush.bf16.msra.mxu1 %v965_v2  ;;  %667 = vmatpush.bf16.msra.mxu2 %v973_v6  ;;  %v974_v33 = vld [vmem:[#allocation11 + $0xc0] sm:$0xff] }
  0x38   :  { %680 = vmatpush.bf16.msra.mxu3 %v981_v7 }
  0x39   :  { %642 = vmatpush.bf16.msra.mxu0 %v956_v4 }
  0x3b   :  { %655 = vmatpush.bf16.msra.mxu1 %v964_v5  ;;  %668 = vmatpush.bf16.msra.mxu2 %v972_v10 }
  0x3c   :  { %681 = vmatpush.bf16.msra.mxu3 %v980_v11 }
  0x3d   :  { %643 = vmatpush.bf16.msra.mxu0 %v955_v8 }
  0x3f   :  { %656 = vmatpush.bf16.msra.mxu1 %v963_v9  ;;  %669 = vmatpush.bf16.msra.mxu2 %v971_v14  ;;  %v993_v9 = vld [vmem:[%s1261_s6] ss:$0 sm:$0xff] }
  0x40   :  { %682 = vmatpush.bf16.msra.mxu3 %v979_v15 }
  0x41   :  { %644 = vmatpush.bf16.msra.mxu0 %v954_v12 }
  0x43   :  { %657 = vmatpush.bf16.msra.mxu1 %v962_v13  ;;  %670 = vmatpush.bf16.msra.mxu2 %v970_v18 }
  0x44   :  { %683 = vmatpush.bf16.msra.mxu3 %v978_v19 }
  0x45   :  { %645 = vmatpush.bf16.msra.mxu0 %v953_v16 }
  0x47   :  { %658 = vmatpush.bf16.msra.mxu1 %v961_v17  ;;  %671 = vmatpush.bf16.msra.mxu2 %v969_v22 }
  0x48   :  { %684 = vmatpush.bf16.msra.mxu3 %v977_v23 }
  0x49   :  { %646 = vmatpush.bf16.msra.mxu0 %v952_v20 }
  0x4b   :  { %659 = vmatpush.bf16.msra.mxu1 %v960_v21  ;;  %672 = vmatpush.bf16.msra.mxu2 %v968_v26 }
  0x4c   :  { %685 = vmatpush.bf16.msra.mxu3 %v976_v27 }
  0x4d   :  { %647 = vmatpush.bf16.msra.mxu0 %v951_v24 }
  0x4f   :  { %660 = vmatpush.bf16.msra.mxu1 %v959_v25  ;;  %673 = vmatpush.bf16.msra.mxu2 %v967_v30 }
  0x50   :  { %686 = vmatpush.bf16.msra.mxu3 %v975_v31 }
  0x51   :  { %648 = vmatpush.bf16.msra.mxu0 %v950_v28 }
  0x53   :  { %661 = vmatpush.bf16.msra.mxu1 %v958_v29  ;;  %674 = vmatpush.bf16.msra.mxu2 %v966_v32 }
  0x54   :  { %687 = vmatpush.bf16.msra.mxu3 %v974_v33 }
  0xa1   :  { %v180_v34 = vpop.f32.mrf.mxu0  ;;  %v193_v35 = vpop.f32.mrf.mxu1 }
  0xa8   :  { %v206_v36 = vpop.f32.mrf.mxu2 }
  0xa9   :  { %v219_v37 = vpop.f32.mrf.mxu3  ;;  %v182_v38 = vpop.f32.mrf.mxu0 }
  0xaa   :  { %v195_v39 = vpop.f32.mrf.mxu1 }
  0xb0   :  { %v208_v41 = vpop.f32.mrf.mxu2 }
  0xb1   :  { %v221_v42 = vpop.f32.mrf.mxu3  ;;  %v316_v44 = vpop.f32.mrf.mxu0 }
  0xb2   :  { %v317_v46 = vadd.f32 %v316_v44, %v180_v34 }
  0xb3   :  { %v329_v47 = vpop.f32.mrf.mxu1 }
  0xb4   :  { %v330_v48 = vadd.f32 %v329_v47, %v193_v35  ;;  %v369_v49 = vadd.f32 %v361_v43, %v317_v46 }
  0xb6   :  { %v370_v50 = vadd.f32 %v362_v45, %v330_v48  ;;  %v373_v51 = vmax.f32 %v369_v49, 0.0 }
  0xb8   :  { %v374_v53 = vmax.f32 %v370_v50, 0.0  ;;  %v342_v54 = vpop.f32.mrf.mxu2  ;;  %v377_v56 = vpack.c.bf16 %v373_v51, %v373_v51 }
  0xb9   :  { %v343_v57 = vadd.f32 %v342_v54, %v206_v36  ;;  %v355_v58 = vpop.f32.mrf.mxu3  ;;  %v318_v61 = vpop.f32.mrf.mxu0 }
  0xba   :  { %v378_v59 = vpack.c.bf16 %v374_v53, %v374_v53  ;;  %v356_v60 = vadd.f32 %v355_v58, %v219_v37  ;;  %649 = vmatmul.bf16.vlgmr.msra.gmra.mxu0 %v377_v56 }
  0xbb   :  { %v371_v62 = vadd.f32 %v363_v52, %v343_v57  ;;  %v331_v63 = vpop.f32.mrf.mxu1 }
  0xbc   :  { %v372_v0 = vadd.f32 %v364_v55, %v356_v60  ;;  %662 = vmatmul.bf16.vlgmr.msra.gmra.mxu1 %v378_v59 }
  0xbd   :  { %v375_v1 = vmax.f32 %v371_v62, 0.0 }
  0xbe   :  { %v376_v2 = vmax.f32 %v372_v0, 0.0 }
  0xbf   :  { %v379_v3 = vpack.c.bf16 %v375_v1, %v375_v1 }
  0xc0   :  { %v380_v4 = vpack.c.bf16 %v376_v2, %v376_v2  ;;  %v344_v5 = vpop.f32.mrf.mxu2 }
  0xc1   :  { %v357_v6 = vpop.f32.mrf.mxu3  ;;  %675 = vmatmul.bf16.vlgmr.msra.gmra.mxu2 %v379_v3 }
  0xc2   :  { %688 = vmatmul.bf16.vlgmr.msra.gmra.mxu3 %v380_v4 }
 0x137   :  { %v650_v7 = vpop.f32.mrf.mxu0 }
 0x138   :  { %v651_v10 = vadd.f32 %v993_v9, %v650_v7 }
 0x139   :  { %v663_v8 = vpop.f32.mrf.mxu1 }
 0x13a   :  { %v664_v13 = vadd.f32 %v663_v8, %v651_v10 }
 0x13f   :  { %v652_v11 = vpop.f32.mrf.mxu0 }
 0x141   :  { %v665_v12 = vpop.f32.mrf.mxu1 }
 0x144   :  { %v676_v14 = vpop.f32.mrf.mxu2 }
 0x145   :  { %v677_v15 = vadd.f32 %v676_v14, %v664_v13  ;;  %v689_v16 = vpop.f32.mrf.mxu3 }
 0x147   :  { %v690_v17 = vadd.f32 %v689_v16, %v677_v15 }
 0x149   :  { %693 = vst [vmem:[#allocation13] sm:$0xff] %v690_v17 }
 0x14a   :  { %704 = dma.vmem_to_hbm [thread:$0]  %s700_s9, 128, %s702_s12, [#allocation4]  }
 0x14c   :  { %v678_v18 = vpop.f32.mrf.mxu2 }
 0x14d   :  { %v691_v19 = vpop.f32.mrf.mxu3 }
 0x14e   :  { %1170 = dma.done.wait [#allocation4], 128  }
 0x14f   :  { %1171 = vsyncadd [#allocation4], 4294967168 }
 0x150   :  { %709 = vsyncpa [#allocation3], 1 }
 0x151   :  { %710 = vsyncpa [#allocation6], 1 }
 0x152   :  { %711 = vsyncpa [#allocation9], 1 }
 0x153   :  { %712 = vsyncpa [#allocation12], 1 }
 0x154   :  { %713 = vsyncpa [#allocation4], 1 }

</bundles_post_ra>
